<compile_context>
chip_gen: v6e
topology: v6e:2x2x1
jax: 0.10.0
libtpu: 0.0.40
codegen_flags: <defaults>
</compile_context>

<pallas_src>
from functools import partial

import jax
import jax.numpy as jnp
from jax.experimental import pallas as pl
from jax.experimental.pallas import tpu as pltpu

BN_EPS = 1e-5
LANES = 128
DEFAULT_BLOCK_ROWS = 2048      # rows of 128 batch elements per grid step (~2 MB of x)


def _affine_pairsum_kernel(wpat_ref, psum_ref, b_ref, z_ref, o_ref):
    """out[o, s, l] = sum_f w_eff[f, o] * x[row_base + s*128 + l, f] + b_eff[o].

    wpat_ref: (O, 128*F) f32 VMEM, resident   wpat[o, l*F + f] = w_eff[f, o]
    psum_ref: (128*F, 128) bf16 VMEM, resident (0/1 pair-sum / compaction matrix)
    b_ref   : (O,) f32 SMEM
    z_ref   : (TS, 128*F) f32 VMEM tile        z[s, l*F + f] = x[row + l, f]
    o_ref   : (O, TS, 128) f32 VMEM tile       lane-dense output
    """
    z = z_ref[...]                      # (TS, 128*F) f32
    p = psum_ref[...]                   # (128*F, 128) bf16, exact 0/1
    n_out = o_ref.shape[0]              # tiny & static -> unrolled
    for o in range(n_out):
        u = z * wpat_ref[o:o + 1, :]    # exact f32 products w_eff[f,o] * x[b,f]
        # Exact 3-term bf16 split: u == t0 + t1 + t2 (24 mantissa bits = 3 x 8).
        t0 = u.astype(jnp.bfloat16)
        r = u - t0.astype(jnp.float32)
        t1 = r.astype(jnp.bfloat16)
        r = r - t1.astype(jnp.float32)
        t2 = r.astype(jnp.bfloat16)
        # Pair-sum + lane compaction on the MXU (3 dense bf16 passes, DMA-bound).
        acc = jnp.dot(t0, p, preferred_element_type=jnp.float32)
        acc = acc + jnp.dot(t1, p, preferred_element_type=jnp.float32)
        acc = acc + jnp.dot(t2, p, preferred_element_type=jnp.float32)
        o_ref[o, :, :] = acc + b_ref[o]


def _round_up(a, m):
    return (a + m - 1) // m * m


def _pick_block_rows(rows: int, requested: int) -> int:
    """Choose the sublane tile size (rows of 128 batch elements per grid step)."""
    if rows <= 8:
        return rows                     # single full-extent block
    ts = min(requested, rows)
    if ts == rows and rows >= 16:
        ts = rows // 2                  # >=2 "parallel" steps -> both v7x TCs busy
    ts = max(8, (ts // 8) * 8)          # (8,128) sublane alignment
    return min(ts, rows)


@partial(jax.jit, static_argnames=("block_rows",))
def linear_regression_forward(x, params, block_rows=DEFAULT_BLOCK_ROWS):
    """x: (B, F) float32 -> (B, O) float32."""
    x = x.astype(jnp.float32)
    B, F = x.shape
    O = params["w_t"].shape[1]

    # ---- Fold BatchNorm(eval) + output de-normalization into one affine (f32) ----
    scale = params["gamma"] * jax.lax.rsqrt(params["running_var"] + BN_EPS)        # (1, F)
    w_eff = (params["w_t"] * scale.reshape(F, 1)) * params["y_std"].reshape(1, O)  # (F, O)
    b_eff = (((params["beta"] - params["running_mean"] * scale) @ params["w_t"])
             + params["bias"]) * params["y_std"] + params["y_mean"]                # (1, O)

    # Per-output lane-weight pattern: wpat[o, l*F + f] = w_eff[f, o]
    wpat = jnp.tile(w_eff.T.reshape(O, 1, F), (1, LANES, 1)).reshape(O, LANES * F)
    # 0/1 pair-sum / compaction matrix: psum[l*F + f, l'] = (l == l'); exact in bf16.
    psum = jnp.kron(jnp.eye(LANES, dtype=jnp.float32),
                    jnp.ones((F, 1), jnp.float32)).astype(jnp.bfloat16)            # (128F, 128)
    b_flat = b_eff.reshape(O)

    # ---- Natural layout: pad batch only to a multiple of 128 (skipped if aligned),
    #      then a FREE contiguous reshape to rows of 128 interleaved batch elements.
    B_pad = _round_up(B, LANES)
    if B_pad != B:
        x = jnp.pad(x, ((0, B_pad - B), (0, 0)))   # the only extra HBM pass; absent
                                                   # when B is already lane-aligned
    rows = B_pad // LANES
    z = x.reshape(rows, LANES * F)                 # zero-copy view of row-major x

    ts = _pick_block_rows(rows, block_rows)

    out = pl.pallas_call(
        _affine_pairsum_kernel,
        out_shape=jax.ShapeDtypeStruct((O, rows, LANES), jnp.float32),
        grid=(pl.cdiv(rows, ts),),                 # ragged last block is fine
        in_specs=[
            pl.BlockSpec((O, LANES * F), lambda i: (0, 0)),        # wpat (resident)
            pl.BlockSpec((LANES * F, LANES), lambda i: (0, 0)),    # psum (resident)
            pl.BlockSpec(memory_space=pltpu.MemorySpace.SMEM),     # b_eff scalars
            pl.BlockSpec((ts, LANES * F), lambda i: (i, 0)),       # x slab
        ],
        out_specs=pl.BlockSpec((O, ts, LANES), lambda i: (0, i, 0)),
        compiler_params=pltpu.CompilerParams(
            dimension_semantics=("parallel",)),
    )(wpat, psum, b_flat, z)

    # (O, rows, 128) -> (O, B_pad) is a free reshape; slice off padding; (1,B).T is free.
    return out.reshape(O, B_pad)[:, :B].T


def init_params(key, input_features=2, output_features=1):
    """Synthetic parameters matching the PyTorch module's shapes.

    (A freshly constructed module would have gamma=1, beta=0, running_mean=0,
    running_var=1, y_mean=0, y_std=1; non-trivial values are used here so the
    BN / de-normalization folding is actually exercised.)
    """
    kw, kb, ks = jax.random.split(key, 3)
    bound = 1.0 / jnp.sqrt(input_features)
    # torch Linear weight is (out, in); store transposed (in, out) for the math.
    w = jax.random.uniform(kw, (output_features, input_features),
                           jnp.float32, -bound, bound)
    b = jax.random.uniform(kb, (output_features,), jnp.float32, -bound, bound)
    stats = jax.random.normal(ks, (4, input_features), jnp.float32) * 0.1
    return {
        "w_t": w.T,                                                  # (F, O)
        "bias": b.reshape(1, output_features),                       # (1, O)
        "gamma": 1.0 + stats[0:1],                                   # (1, F)
        "beta": stats[1:2],                                          # (1, F)
        "running_mean": stats[2:3],                                  # (1, F)
        "running_var": 1.0 + jnp.abs(stats[3:4]),                    # (1, F)
        "y_mean": jnp.full((1, output_features), 0.5, jnp.float32),  # (1, O)
        "y_std": jnp.full((1, output_features), 2.0, jnp.float32),   # (1, O)
    }


def reference_forward(x, p):
    x_norm = (x - p["running_mean"]) * jax.lax.rsqrt(p["running_var"] + BN_EPS)
    x_norm = x_norm * p["gamma"] + p["beta"]
    out = x_norm @ p["w_t"] + p["bias"]
    return out * p["y_std"] + p["y_mean"]


if __name__ == "__main__":
    key = jax.random.PRNGKey(0)
    k_param, k_x1, k_x2, k_x3 = jax.random.split(key, 4)

    input_features, output_features = 2, 1
    params = init_params(k_param, input_features, output_features)

    # Small shape consistent with the module: batch=8, features=2 -> out=1.
    x_small = jax.random.normal(k_x1, (8, input_features), jnp.float32)
    out_small = jax.block_until_ready(linear_regression_forward(x_small, params))
    assert out_small.shape == (8, output_features)
    assert jnp.allclose(out_small, reference_forward(x_small, params),
                        atol=2e-5, rtol=2e-5)

    # Lane-aligned batch (no pad copy at all), multiple grid steps.
    x_mid = jax.random.normal(k_x2, (2048, input_features), jnp.float32)
    out_mid = jax.block_until_ready(
        linear_regression_forward(x_mid, params, block_rows=8))
    assert out_mid.shape == (2048, output_features)
    assert jnp.allclose(out_mid, reference_forward(x_mid, params),
                        atol=2e-5, rtol=2e-5)

    # Unaligned batch: padded to 5120, ragged last grid block.
    x_big = jax.random.normal(k_x3, (5000, input_features), jnp.float32)
    out_big = jax.block_until_ready(
        linear_regression_forward(x_big, params, block_rows=16))
    assert out_big.shape == (5000, output_features)
    assert jnp.allclose(out_big, reference_forward(x_big, params),
                        atol=2e-5, rtol=2e-5)

    print("KERNEL_OK")
</pallas_src>

<mosaic_0001>
module attributes {stable_mosaic.version = 11 : i64} {
  func.func @_affine_pairsum_kernel(%arg0: i32, %arg1: memref<1x256xf32, #tpu.memory_space<vmem>>, %arg2: memref<256x128xbf16, #tpu.memory_space<vmem>>, %arg3: memref<1xf32, #tpu.memory_space<smem>>, %arg4: memref<1x256xf32, #tpu.memory_space<vmem>>, %arg5: memref<1x1x128xf32, #tpu.memory_space<vmem>>) attributes {dimension_semantics = [#tpu.dimension_semantics<parallel>], iteration_bounds = array<i64: 1>, scalar_prefetch = 0 : i64, scratch_operands = 0 : i64, tpu.core_type = #tpu.core_type<tc>, window_params = [{pipeline_mode = #tpu.pipeline_mode<synchronous>, transform_indices = @transform_0, window_bounds = array<i64: 1, 256>}, {pipeline_mode = #tpu.pipeline_mode<synchronous>, transform_indices = @transform_1, window_bounds = array<i64: 256, 128>}, {transform_indices = @transform_2, window_bounds = array<i64: 1>}, {transform_indices = @transform_3, window_bounds = array<i64: 1, 256>}, {transform_indices = @transform_4, window_bounds = array<i64: 1, 1, 128>}]} {
    %c0 = arith.constant 0 : index
    %c0_0 = arith.constant 0 : index
    %0 = vector.load %arg4[%c0, %c0_0] : memref<1x256xf32, #tpu.memory_space<vmem>>, vector<1x256xf32>
    %c0_1 = arith.constant 0 : index
    %c0_2 = arith.constant 0 : index
    %1 = vector.load %arg2[%c0_1, %c0_2] : memref<256x128xbf16, #tpu.memory_space<vmem>>, vector<256x128xbf16>
    %c0_3 = arith.constant 0 : index
    %c0_4 = arith.constant 0 : index
    %2 = vector.load %arg1[%c0_3, %c0_4] : memref<1x256xf32, #tpu.memory_space<vmem>>, vector<1x256xf32>
    %3 = arith.mulf %0, %2 : vector<1x256xf32>
    %4 = arith.truncf %3 : vector<1x256xf32> to vector<1x256xbf16>
    %5 = arith.extf %4 : vector<1x256xbf16> to vector<1x256xf32>
    %6 = arith.subf %3, %5 : vector<1x256xf32>
    %7 = arith.truncf %6 : vector<1x256xf32> to vector<1x256xbf16>
    %8 = arith.extf %7 : vector<1x256xbf16> to vector<1x256xf32>
    %9 = arith.subf %6, %8 : vector<1x256xf32>
    %10 = arith.truncf %9 : vector<1x256xf32> to vector<1x256xbf16>
    %cst = arith.constant dense<0.000000e+00> : vector<1x128xf32>
    %11 = tpu.matmul %4, %1, %cst {dimension_numbers = #tpu.dot_dimension_numbers<[1], [0], [0], [1], [0, 0, 1, 1], [], []>} : vector<1x256xbf16>, vector<256x128xbf16>, vector<1x128xf32> -> vector<1x128xf32>
    %cst_5 = arith.constant dense<0.000000e+00> : vector<1x128xf32>
    %12 = tpu.matmul %7, %1, %cst_5 {dimension_numbers = #tpu.dot_dimension_numbers<[1], [0], [0], [1], [0, 0, 1, 1], [], []>} : vector<1x256xbf16>, vector<256x128xbf16>, vector<1x128xf32> -> vector<1x128xf32>
    %13 = arith.addf %11, %12 : vector<1x128xf32>
    %cst_6 = arith.constant dense<0.000000e+00> : vector<1x128xf32>
    %14 = tpu.matmul %10, %1, %cst_6 {dimension_numbers = #tpu.dot_dimension_numbers<[1], [0], [0], [1], [0, 0, 1, 1], [], []>} : vector<1x256xbf16>, vector<256x128xbf16>, vector<1x128xf32> -> vector<1x128xf32>
    %15 = arith.addf %13, %14 : vector<1x128xf32>
    %c0_7 = arith.constant 0 : index
    %16 = memref.load %arg3[%c0_7] : memref<1xf32, #tpu.memory_space<smem>>
    %17 = vector.broadcast %16 : f32 to vector<1x128xf32>
    %18 = arith.addf %15, %17 : vector<1x128xf32>
    %c0_8 = arith.constant 0 : index
    %c0_9 = arith.constant 0 : index
    %c0_10 = arith.constant 0 : index
    %19 = vector.load %arg5[%c0_8, %c0_9, %c0_10] : memref<1x1x128xf32, #tpu.memory_space<vmem>>, vector<1x1x128xf32>
    %20 = vector.shape_cast %19 : vector<1x1x128xf32> to vector<1x128xf32>
    %21 = vector.shape_cast %18 : vector<1x128xf32> to vector<1x1x128xf32>
    tpu.vector_store %arg5[%c0_8, %c0_9, %c0_10], %21 {strides = array<i32>} : memref<1x1x128xf32, #tpu.memory_space<vmem>>, vector<1x1x128xf32>,
    return
  }
  func.func @transform_0(%arg0: i32) -> (i32, i32) {
    %c0_i32 = arith.constant 0 : i32
    %c0_i32_0 = arith.constant 0 : i32
    %c0_i32_1 = arith.constant 0 : i32
    return %c0_i32, %c0_i32_0 : i32, i32
  }
  func.func @transform_1(%arg0: i32) -> (i32, i32) {
    %c0_i32 = arith.constant 0 : i32
    %c0_i32_0 = arith.constant 0 : i32
    %c0_i32_1 = arith.constant 0 : i32
    return %c0_i32, %c0_i32_0 : i32, i32
  }
  func.func @transform_2(%arg0: i32) -> i32 {
    %c0_i32 = arith.constant 0 : i32
    %c0_i32_0 = arith.constant 0 : i32
    return %c0_i32 : i32
  }
  func.func @transform_3(%arg0: i32) -> (i32, i32) {
    %c0_i32 = arith.constant 0 : i32
    %c0_i32_0 = arith.constant 0 : i32
    return %arg0, %c0_i32 : i32, i32
  }
  func.func @transform_4(%arg0: i32) -> (i32, i32, i32) {
    %c0_i32 = arith.constant 0 : i32
    %c0_i32_0 = arith.constant 0 : i32
    %c0_i32_1 = arith.constant 0 : i32
    return %c0_i32, %arg0, %c0_i32_0 : i32, i32, i32
  }
}

</mosaic_0001>

<bundles_post_ra>
// kernel: linear_regression_forward.1
= control target key start
LH: loop header
LB: loop body
LE: loop exit
PB: predicated region body
PF: predicated region fallthrough
CT: control target
= control target key end

     0   :  { %v55_v5 = vlaneseq  ;;  %v459_v14 = vmov 1966171168   ;;  %s600_s1 = inlined_call_operand.vmem [shape: bf16[256,128], index: 1, kind: input, shape index: {}]   ;;  %s601_s0 = inlined_call_operand.vmem [shape: f32[1,256], index: 0, kind: input, shape index: {}]   ;;  %s602_s3 = inlined_call_operand.vmem [shape: f32[1,256], index: 3, kind: input, shape index: {}]   ;;  %s603_s2 = inlined_call_operand.<no memory space> [shape: f32[1], index: 2, kind: input, shape index: {}]   ;;  %s604_s4 = inlined_call_operand.vmem [shape: f32[1,1,128], index: 4, kind: output, shape index: {}]  }
   0x1   :  { %v488_v0 = vld [vmem:[%s600_s1 + $0x78] sm:$0xff]   ;;  %v500_v2 = vld [vmem:[%s600_s1 + $0x70] sm:$0xff]   ;;  %v514_v4 = vld [vmem:[%s600_s1 + $0x68] sm:$0xff]   ;;  %v73_v15 = vunpack.c.l.s4 %v459_v14 }
   0x2   :  { %v493_v1 = vld [vmem:[%s600_s1 + $0x38] sm:$0xff]   ;;  %376 = vmatprep.subr.bf16.mxu0 %v488_v0  ;;  %398 = vmatprep.subr.bf16.mxu1 %v488_v0  ;;  %v507_v3 = vld [vmem:[%s600_s1 + $0x30] sm:$0xff]   ;;  %v521_v6 = vld [vmem:[%s600_s1 + $0x28] sm:$0xff]   ;;  %v56_v8 = vshrl.u32 %v55_v5, 7 }
   0x3   :  { %377 = vmatpush3.bf16.msra.mxu0 %v493_v1  ;;  %399 = vmatpush3.bf16.msra.mxu1 %v493_v1  ;;  %v528_v7 = vld [vmem:[%s600_s1 + $0x60] sm:$0xff]   ;;  %v542_v10 = vld [vmem:[%s600_s1 + $0x58] sm:$0xff]   ;;  %v453_v16 = vld [vmem:[%s600_s1 + $0x50] sm:$0xff]   ;;  %v74_v23 = vunpack.c.0.s8 %v73_v15 }
   0x4   :  { %378 = vmatprep.subr.bf16.mxu0 %v500_v2  ;;  %400 = vmatprep.subr.bf16.mxu1 %v500_v2  ;;  %v535_v9 = vld [vmem:[%s600_s1 + $0x20] sm:$0xff]   ;;  %v544_v11 = vsub.s32 0, %v56_v8  ;;  %v551_v12 = vld [vmem:[%s600_s1 + $0x18] sm:$0xff]   ;;  %v61_v13 = vsub.s32 1, %v56_v8  ;;  %v454_v20 = vld [vmem:[%s600_s1 + $0x10] sm:$0xff]  }
   0x5   :  { %v19_v17 = vld [vmem:[%s602_s3] sm:$0x3]  ;;  %v455_v24 = vld [vmem:[%s600_s1 + $0x48] sm:$0xff]   ;;  %v77_v30 = vsub.s32 %v74_v23, %v56_v8 }
   0x6   :  { %v52_v18 = vld [vmem:[%s601_s0] sm:$0x3]  ;;  %v456_v27 = vld [vmem:[%s600_s1 + $0x8] sm:$0xff]  }
   0x7   :  { %379 = vmatpush3.bf16.msra.mxu0 %v507_v3  ;;  %401 = vmatpush3.bf16.msra.mxu1 %v507_v3  ;;  %v53_v19 = vmul.f32 %v52_v18, %v19_v17  ;;  %v457_v31 = vld [vmem:[%s600_s1 + $0x40] sm:$0xff]  }
   0x8   :  { %380 = vmatprep.subr.bf16.mxu0 %v514_v4  ;;  %402 = vmatprep.subr.bf16.mxu1 %v514_v4  ;;  %v458_v33 = vld [vmem:[%s600_s1] sm:$0xff]  }
   0x9   :  { %v58_v21 = vrot.slane %v53_v19, %v544_v11  ;;  %v62_v22 = vrot.slane %v53_v19, %v61_v13 }
   0xb   :  { %381 = vmatpush3.bf16.msra.mxu0 %v521_v6  ;;  %403 = vmatpush3.bf16.msra.mxu1 %v521_v6  ;;  %v65_v25 = vpack.c.bf16 %v58_v21, %v58_v21  ;;  %v66_v26 = vpack.c.bf16 %v62_v22, %v62_v22 }
   0xc   :  { %382 = vmatprep.subr.bf16.mxu0 %v528_v7  ;;  %404 = vmatprep.subr.bf16.mxu1 %v528_v7 }
   0xd   :  { %v67_v28 = vunpack.c.l.bf16 %v65_v25  ;;  %v68_v29 = vunpack.c.l.bf16 %v66_v26  ;;  %303 = vmatprep.mubr.bf16.mxu1 %v66_v26 }
   0xf   :  { %383 = vmatpush3.bf16.msra.mxu0 %v535_v9  ;;  %405 = vmatpush3.bf16.msra.mxu1 %v535_v9  ;;  %v71_v32 = vcombine.low %v67_v28, %v68_v29 }
  0x10   :  { %384 = vmatprep.subr.bf16.mxu0 %v542_v10  ;;  %406 = vmatprep.subr.bf16.mxu1 %v542_v10 }
  0x11   :  { %v78_v34 = vrot.slane %v71_v32, %v77_v30 }
  0x13   :  { %385 = vmatpush3.bf16.msra.mxu0 %v551_v12  ;;  %407 = vmatpush3.bf16.msra.mxu1 %v551_v12  ;;  %v85_v35 = vrot.slane %v78_v34, %v77_v30 }
  0x14   :  { %386 = vmatprep.subr.bf16.mxu0 %v453_v16  ;;  %408 = vmatprep.subr.bf16.mxu1 %v453_v16 }
  0x15   :  { %v87_v36 = vsub.f32 %v53_v19, %v85_v35 }
  0x17   :  { %387 = vmatpush3.bf16.msra.mxu0 %v454_v20  ;;  %409 = vmatpush3.bf16.msra.mxu1 %v454_v20  ;;  %v96_v37 = vrot.slane %v87_v36, %v61_v13  ;;  %v92_v38 = vrot.slane %v87_v36, %v544_v11 }
  0x18   :  { %388 = vmatprep.subr.bf16.mxu0 %v455_v24  ;;  %410 = vmatprep.subr.bf16.mxu1 %v455_v24 }
  0x19   :  { %v100_v39 = vpack.c.bf16 %v96_v37, %v96_v37  ;;  %v99_v40 = vpack.c.bf16 %v92_v38, %v92_v38 }
  0x1b   :  { %389 = vmatpush3.bf16.msra.mxu0 %v456_v27  ;;  %411 = vmatpush3.bf16.msra.mxu1 %v456_v27  ;;  %v102_v41 = vunpack.c.l.bf16 %v100_v39  ;;  %v101_v42 = vunpack.c.l.bf16 %v99_v40 }
  0x1c   :  { %390 = vmatprep.subr.bf16.mxu0 %v457_v31  ;;  %412 = vmatprep.subr.bf16.mxu1 %v457_v31 }
  0x1d   :  { %263 = vmatprep.mubr.bf16.mxu0 %v100_v39  ;;  %v105_v43 = vcombine.low %v101_v42, %v102_v41 }
  0x1f   :  { %391 = vmatpush3.bf16.msra.mxu0 %v458_v33  ;;  %413 = vmatpush3.bf16.msra.mxu1 %v458_v33  ;;  %v112_v44 = vrot.slane %v105_v43, %v77_v30 }
  0x20   :  { %420 = vmatprep.subr.bf16.mxu0 %v488_v0 }
  0x21   :  { %v119_v45 = vrot.slane %v112_v44, %v77_v30 }
  0x22   :  { %304 = vmatmul.mubr.bf16.vlgmr.msra.gmra.mxu1 %v65_v25  ;;  %264 = vmatmul.mubr.bf16.vlgmr.msra.gmra.mxu0 %v99_v40 }
  0x23   :  { %421 = vmatpush3.bf16.msra.mxu0 %v493_v1  ;;  %v121_v46 = vsub.f32 %v87_v36, %v119_v45  ;;  %v353_v1 = vstv %s603_s2 }
  0x24   :  { %422 = vmatprep.subr.bf16.mxu0 %v500_v2 }
  0x25   :  { %v130_v47 = vrot.slane %v121_v46, %v61_v13  ;;  %v126_v49 = vrot.slane %v121_v46, %v544_v11 }
  0x27   :  { %423 = vmatpush3.bf16.msra.mxu0 %v507_v3  ;;  %v134_v48 = vpack.c.bf16 %v130_v47, %v130_v47  ;;  %v133_v50 = vpack.c.bf16 %v126_v49, %v126_v49 }
  0x28   :  { %424 = vmatprep.subr.bf16.mxu0 %v514_v4 }
  0x29   :  { %343 = vmatprep.mubr.bf16.mxu0 %v134_v48 }
  0x2b   :  { %425 = vmatpush3.bf16.msra.mxu0 %v521_v6 }
  0x2c   :  { %426 = vmatprep.subr.bf16.mxu0 %v528_v7 }
  0x2f   :  { %427 = vmatpush3.bf16.msra.mxu0 %v535_v9 }
  0x30   :  { %428 = vmatprep.subr.bf16.mxu0 %v542_v10 }
  0x33   :  { %429 = vmatpush3.bf16.msra.mxu0 %v551_v12 }
  0x34   :  { %430 = vmatprep.subr.bf16.mxu0 %v453_v16 }
  0x37   :  { %431 = vmatpush3.bf16.msra.mxu0 %v454_v20 }
  0x38   :  { %432 = vmatprep.subr.bf16.mxu0 %v455_v24 }
  0x3b   :  { %433 = vmatpush3.bf16.msra.mxu0 %v456_v27 }
  0x3c   :  { %434 = vmatprep.subr.bf16.mxu0 %v457_v31 }
  0x3f   :  { %435 = vmatpush3.bf16.msra.mxu0 %v458_v33 }
  0x42   :  { %344 = vmatmul.mubr.bf16.vlgmr.msra.gmra.mxu0 %v133_v50 }
  0xe2   :  { %v414_v51 = vpop.f32.mrf.mxu1  ;;  %v392_v53 = vpop.f32.mrf.mxu0 }
  0xe4   :  { %v415_v52 = vpop.f32.mrf.mxu1  ;;  %v393_v55 = vpop.f32.mrf.mxu0 }
  0xe5   :  { %v394_v59 = vadd.f32 %v393_v55, %v392_v53  ;;  %v416_v60 = vadd.f32 %v415_v52, %v414_v51 }
  0xe6   :  { %v417_v54 = vpop.f32.mrf.mxu1  ;;  %v395_v57 = vpop.f32.mrf.mxu0 }
  0xe7   :  { %v306_v63 = vadd.f32 %v416_v60, %v394_v59 }
  0xe8   :  { %v418_v56 = vpop.f32.mrf.mxu1  ;;  %v396_v58 = vpop.f32.mrf.mxu0 }
 0x102   :  { %v436_v61 = vpop.f32.mrf.mxu0 }
 0x104   :  { %v437_v62 = vpop.f32.mrf.mxu0 }
 0x105   :  { %v438_v0 = vadd.f32 %v437_v62, %v436_v61 }
 0x106   :  { %v439_v2 = vpop.f32.mrf.mxu0 }
 0x107   :  { %v351_v3 = vadd.f32 %v438_v0, %v306_v63 }
 0x108   :  { %v440_v4 = vpop.f32.mrf.mxu0 }
 0x109   :  { %v354_v5 = vadd.f32 %v353_v1, %v351_v3 }
 0x10b   :  { %355 = vst [vmem:[%s604_s4] sm:$0x1] %v354_v5 }

</bundles_post_ra>
